<compile_context>
chip_gen: v7x
topology: tpu7x:2x2x1
jax: 0.10.0
libtpu: 0.0.40
codegen_flags: <defaults>
</compile_context>

<pallas_src>
import jax
import jax.numpy as jnp
from jax.experimental import pallas as pl
from jax.experimental.pallas import tpu as pltpu


def _round_up(v, m):
    return ((v + m - 1) // m) * m


def _shrink_pow2_tile(t, cap):
    # shrink a power-of-two-multiple-of-128 tile until it fits `cap` (>=128)
    while t > cap:
        t //= 2
    return max(t, 128)


def _tile_config():
    """(TM, TK, vmem_limit_bytes) per TPU generation."""
    try:
        kind = jax.devices()[0].device_kind.lower()
    except Exception:
        kind = ""
    if "v5 lite" in kind or "v5e" in kind:
        # 512 KiB bf16 A tiles (1 MiB double-buffered) amortize per-step overhead.
        return 256, 1024, 32 * 1024 * 1024
    if "v6" in kind:
        return 512, 2048, 32 * 1024 * 1024
    # v7x (64 MiB physical per TensorCore) and unknown chips.
    return 512, 2048, 32 * 1024 * 1024


def sage_kernel(a_ref, xk_ref, xi_ref, dinv_ref, wl_ref, wr_ref, b_ref,
                o_ref, acc_ref):
    # a_ref   : [TM, TK]  bf16 0/1 adjacency tile (row = target node)
    # xk_ref  : [TK, FI]  bf16 neighbor-feature tile (contraction operand)
    # xi_ref  : [TM, FI]  bf16 root-feature tile for these output rows
    # dinv_ref: [TM, 1]   f32  1/deg for these output rows
    # wl_ref  : [FI, FO]  bf16 W_l^T (resident)
    # wr_ref  : [FI, FO]  bf16 W_r^T (resident)
    # b_ref   : [1, FO]   f32  neighbor-branch bias
    # o_ref   : [TM, FO]  f32  output tile
    # acc_ref : [TM, FI]  f32  running aggregation accumulator (scratch)
    k = pl.program_id(1)

    @pl.when(k == 0)
    def _init():
        acc_ref[...] = jnp.zeros_like(acc_ref)

    # HBM-bound stage: stream bf16 A / X tiles, accumulate sum-aggregation in f32.
    acc_ref[...] += jnp.dot(a_ref[...], xk_ref[...],
                            preferred_element_type=jnp.float32)

    @pl.when(k == pl.num_programs(1) - 1)
    def _finalize():
        # mean = sum * (1/deg), exact f32 per-row scaling (no bf16 1/deg quantization)
        agg = (acc_ref[...] * dinv_ref[...]).astype(jnp.bfloat16)
        # Two native bf16 MXU passes against static resident slices (no concat temp).
        out = jnp.dot(agg, wl_ref[...], preferred_element_type=jnp.float32)
        out += jnp.dot(xi_ref[...], wr_ref[...], preferred_element_type=jnp.float32)
        o_ref[...] = (out + b_ref[...]).astype(o_ref.dtype)


def graphsage_forward(x, edge_index, w_l, b_l, w_r):
    """x: [N, Fin] f32; edge_index: [2, E] int32 (row0=src, row1=dst).
    w_l, w_r: [Fout, Fin] (torch Linear layout); b_l: [Fout]."""
    n, fin = x.shape
    fout = w_l.shape[0]

    # ---- tile / pad sizes: lane-dense 128-aligned, NP divisible by TM and TK ----
    tm_pref, tk_pref, vmem_limit = _tile_config()
    FI = _round_up(max(fin, 128), 128)
    FO = _round_up(max(fout, 128), 128)
    NP0 = _round_up(max(n, 128), 128)
    TM = _shrink_pow2_tile(tm_pref, NP0)
    TK = _shrink_pow2_tile(tk_pref, NP0)
    # Ensure >= 2 row blocks when the graph allows it, so the "parallel" i axis
    # can shard across both v7x TensorCores.
    while TM > 128 and NP0 // TM < 2:
        TM //= 2
    NP = _round_up(NP0, max(TM, TK))      # divisible by both TM and TK (pow2 tiles)

    # ---- build padded operands directly at final dtype/shape (single NP^2 pass) ----
    src, dst = edge_index[0], edge_index[1]
    # exact 0/1 (edge-multiplicity) adjacency, representable exactly in bf16
    a_p = jnp.zeros((NP, NP), jnp.bfloat16).at[dst, src].add(
        jnp.ones(src.shape, jnp.bfloat16))
    deg = jnp.zeros((NP,), jnp.float32).at[dst].add(1.0)
    dinv = jnp.where(deg > 0, 1.0 / jnp.maximum(deg, 1.0), 0.0).reshape(NP, 1)

    x_p = jnp.zeros((NP, FI), jnp.bfloat16).at[:n, :fin].set(x.astype(jnp.bfloat16))
    # resident bf16 weights (halve VMEM, native single-pass bf16 MXU projections)
    wl_p = jnp.zeros((FI, FO), jnp.bfloat16).at[:fin, :fout].set(
        w_l.T.astype(jnp.bfloat16))
    wr_p = jnp.zeros((FI, FO), jnp.bfloat16).at[:fin, :fout].set(
        w_r.T.astype(jnp.bfloat16))
    b_p = jnp.zeros((1, FO), jnp.float32).at[0, :fout].set(b_l)

    grid = (NP // TM, NP // TK)

    cost = pl.CostEstimate(
        flops=2 * NP * NP * FI + 2 * 2 * NP * FI * FO,
        transcendentals=0,
        bytes_accessed=(NP * NP * 2                      # A (bf16)
                        + (NP // TM) * NP * FI * 2       # neighbor X re-streams
                        + NP * FI * 2                    # root X
                        + 2 * FI * FO * 2                # resident weights
                        + NP * 4                         # deg_inv
                        + NP * FO * 4),                  # output (f32)
    )

    out_p = pl.pallas_call(
        sage_kernel,
        out_shape=jax.ShapeDtypeStruct((NP, FO), jnp.float32),
        grid_spec=pltpu.PrefetchScalarGridSpec(
            num_scalar_prefetch=0,
            grid=grid,
            in_specs=[
                pl.BlockSpec((TM, TK), lambda i, k: (i, k)),    # A tile
                pl.BlockSpec((TK, FI), lambda i, k: (k, 0)),    # X (neighbor rows)
                pl.BlockSpec((TM, FI), lambda i, k: (i, 0)),    # X (root rows)
                pl.BlockSpec((TM, 1), lambda i, k: (i, 0)),     # 1/deg
                pl.BlockSpec((FI, FO), lambda i, k: (0, 0)),    # W_l^T (bf16)
                pl.BlockSpec((FI, FO), lambda i, k: (0, 0)),    # W_r^T (bf16)
                pl.BlockSpec((1, FO), lambda i, k: (0, 0)),     # bias
            ],
            out_specs=pl.BlockSpec((TM, FO), lambda i, k: (i, 0)),
            scratch_shapes=[pltpu.VMEM((TM, FI), jnp.float32)],
        ),
        compiler_params=pltpu.CompilerParams(
            dimension_semantics=("parallel", "arbitrary"),
            vmem_limit_bytes=vmem_limit,
        ),
        cost_estimate=cost,
    )(a_p, x_p, x_p, dinv, wl_p, wr_p, b_p)

    return out_p[:n, :fout]


if __name__ == "__main__":
    num_nodes = 5
    num_node_features = 3
    out_channels = 8

    key = jax.random.PRNGKey(0)
    k_x, k_wl, k_bl, k_wr = jax.random.split(key, 4)

    # node features (matches torch.randn((num_nodes, num_node_features)))
    x = jax.random.normal(k_x, (num_nodes, num_node_features), dtype=jnp.float32)

    # directed edges, then made bidirectional as in the reference snippet:
    # edge_index = cat([edge_index, edge_index[[1, 0], :]], dim=1)
    ei = jnp.array([[0, 1, 1, 2, 3],
                    [1, 2, 3, 4, 4]], dtype=jnp.int32)
    edge_index = jnp.concatenate([ei, ei[::-1, :]], axis=1)

    # SAGEConv parameters (lin_l: Linear(in,out,bias=True); lin_r: Linear(in,out,bias=False))
    scale = 1.0 / jnp.sqrt(jnp.float32(num_node_features))
    w_l = jax.random.normal(k_wl, (out_channels, num_node_features), jnp.float32) * scale
    b_l = jax.random.normal(k_bl, (out_channels,), jnp.float32) * scale
    w_r = jax.random.normal(k_wr, (out_channels, num_node_features), jnp.float32) * scale

    out = graphsage_forward(x, edge_index, w_l, b_l, w_r)
    out = jax.block_until_ready(out)

    # ---- pure-JAX references ----
    src, dst = edge_index[0], edge_index[1]
    adj = jnp.zeros((num_nodes, num_nodes)).at[dst, src].add(1.0)
    deg = adj.sum(axis=1, keepdims=True)
    a_mean = jnp.where(deg > 0, adj / jnp.maximum(deg, 1.0), 0.0)

    # f32 reference (kernel streams X / weights in bf16 -> relaxed tolerance)
    ref_f32 = (a_mean @ x) @ w_l.T + b_l + x @ w_r.T
    assert jnp.allclose(out, ref_f32, atol=5e-2, rtol=5e-2), (
        f"f32-ref max abs err {jnp.max(jnp.abs(out - ref_f32))}")

    # bf16-matched reference (same quantization steps as the kernel) -> tight check
    x_bf = x.astype(jnp.bfloat16).astype(jnp.float32)
    wl_bf = w_l.astype(jnp.bfloat16).astype(jnp.float32)
    wr_bf = w_r.astype(jnp.bfloat16).astype(jnp.float32)
    dinv_ref = jnp.where(deg > 0, 1.0 / jnp.maximum(deg, 1.0), 0.0)
    agg_bf = ((adj @ x_bf) * dinv_ref).astype(jnp.bfloat16).astype(jnp.float32)
    ref_bf = agg_bf @ wl_bf.T + b_l + x_bf @ wr_bf.T
    assert jnp.allclose(out, ref_bf, atol=3e-3, rtol=3e-3), (
        f"bf16-ref max abs err {jnp.max(jnp.abs(out - ref_bf))}")

    print("KERNEL_OK")
</pallas_src>

<mosaic_0001>
module attributes {stable_mosaic.version = 11 : i64} {
  func.func @sage_kernel(%arg0: i32, %arg1: i32, %arg2: memref<128x128xbf16, #tpu.memory_space<vmem>>, %arg3: memref<128x128xbf16, #tpu.memory_space<vmem>>, %arg4: memref<128x128xbf16, #tpu.memory_space<vmem>>, %arg5: memref<128x1xf32, #tpu.memory_space<vmem>>, %arg6: memref<128x128xbf16, #tpu.memory_space<vmem>>, %arg7: memref<128x128xbf16, #tpu.memory_space<vmem>>, %arg8: memref<1x128xf32, #tpu.memory_space<vmem>>, %arg9: memref<128x128xf32, #tpu.memory_space<vmem>>, %arg10: memref<128x128xf32, #tpu.memory_space<vmem>>) attributes {dimension_semantics = [#tpu.dimension_semantics<parallel>, #tpu.dimension_semantics<arbitrary>], iteration_bounds = array<i64: 1, 1>, scalar_prefetch = 0 : i64, scratch_operands = 1 : i64, tpu.core_type = #tpu.core_type<tc>, window_params = [{transform_indices = @transform_0, window_bounds = array<i64: 128, 128>}, {transform_indices = @transform_1, window_bounds = array<i64: 128, 128>}, {transform_indices = @transform_2, window_bounds = array<i64: 128, 128>}, {transform_indices = @transform_3, window_bounds = array<i64: 128, 1>}, {pipeline_mode = #tpu.pipeline_mode<synchronous>, transform_indices = @transform_4, window_bounds = array<i64: 128, 128>}, {pipeline_mode = #tpu.pipeline_mode<synchronous>, transform_indices = @transform_5, window_bounds = array<i64: 128, 128>}, {pipeline_mode = #tpu.pipeline_mode<synchronous>, transform_indices = @transform_6, window_bounds = array<i64: 1, 128>}, {transform_indices = @transform_7, window_bounds = array<i64: 128, 128>}]} {
    %c0_i32 = arith.constant 0 : i32
    %0 = arith.cmpi eq, %arg1, %c0_i32 : i32
    %1 = arith.extui %0 : i1 to i32
    %c0_i32_0 = arith.constant 0 : i32
    %2 = arith.cmpi ne, %1, %c0_i32_0 : i32
    scf.if %2 {
      %cst_10 = arith.constant 0.000000e+00 : f32
      %12 = vector.broadcast %cst_10 : f32 to vector<128x128xf32>
      %c0_11 = arith.constant 0 : index
      %c0_12 = arith.constant 0 : index
      %13 = vector.load %arg10[%c0_11, %c0_12] : memref<128x128xf32, #tpu.memory_space<vmem>>, vector<128x128xf32>
      tpu.vector_store %arg10[%c0_11, %c0_12], %12 {strides = array<i32>} : memref<128x128xf32, #tpu.memory_space<vmem>>, vector<128x128xf32>,
    } else {
    }
    %c0 = arith.constant 0 : index
    %c0_1 = arith.constant 0 : index
    %3 = vector.load %arg10[%c0, %c0_1] : memref<128x128xf32, #tpu.memory_space<vmem>>, vector<128x128xf32>
    %c0_2 = arith.constant 0 : index
    %c0_3 = arith.constant 0 : index
    %4 = vector.load %arg2[%c0_2, %c0_3] : memref<128x128xbf16, #tpu.memory_space<vmem>>, vector<128x128xbf16>
    %c0_4 = arith.constant 0 : index
    %c0_5 = arith.constant 0 : index
    %5 = vector.load %arg3[%c0_4, %c0_5] : memref<128x128xbf16, #tpu.memory_space<vmem>>, vector<128x128xbf16>
    %cst = arith.constant dense<0.000000e+00> : vector<128x128xf32>
    %6 = tpu.matmul %4, %5, %cst {dimension_numbers = #tpu.dot_dimension_numbers<[1], [0], [0], [1], [0, 0, 1, 1], [], []>} : vector<128x128xbf16>, vector<128x128xbf16>, vector<128x128xf32> -> vector<128x128xf32>
    %7 = arith.addf %3, %6 : vector<128x128xf32>
    %c0_6 = arith.constant 0 : index
    %c0_7 = arith.constant 0 : index
    %8 = vector.load %arg10[%c0_6, %c0_7] : memref<128x128xf32, #tpu.memory_space<vmem>>, vector<128x128xf32>
    tpu.vector_store %arg10[%c0_6, %c0_7], %7 {strides = array<i32>} : memref<128x128xf32, #tpu.memory_space<vmem>>, vector<128x128xf32>,
    %c0_i32_8 = arith.constant 0 : i32
    %9 = arith.cmpi eq, %arg1, %c0_i32_8 : i32
    %10 = arith.extui %9 : i1 to i32
    %c0_i32_9 = arith.constant 0 : i32
    %11 = arith.cmpi ne, %10, %c0_i32_9 : i32
    scf.if %11 {
      %c0_10 = arith.constant 0 : index
      %c0_11 = arith.constant 0 : index
      %12 = vector.load %arg10[%c0_10, %c0_11] : memref<128x128xf32, #tpu.memory_space<vmem>>, vector<128x128xf32>
      %c0_12 = arith.constant 0 : index
      %c0_13 = arith.constant 0 : index
      %13 = vector.load %arg5[%c0_12, %c0_13] : memref<128x1xf32, #tpu.memory_space<vmem>>, vector<128x1xf32>
      %14 = vector.broadcast %13 : vector<128x1xf32> to vector<128x128xf32>
      %15 = arith.mulf %12, %14 : vector<128x128xf32>
      %16 = arith.truncf %15 : vector<128x128xf32> to vector<128x128xbf16>
      %c0_14 = arith.constant 0 : index
      %c0_15 = arith.constant 0 : index
      %17 = vector.load %arg6[%c0_14, %c0_15] : memref<128x128xbf16, #tpu.memory_space<vmem>>, vector<128x128xbf16>
      %cst_16 = arith.constant dense<0.000000e+00> : vector<128x128xf32>
      %18 = tpu.matmul %16, %17, %cst_16 {dimension_numbers = #tpu.dot_dimension_numbers<[1], [0], [0], [1], [0, 0, 1, 1], [], []>} : vector<128x128xbf16>, vector<128x128xbf16>, vector<128x128xf32> -> vector<128x128xf32>
      %c0_17 = arith.constant 0 : index
      %c0_18 = arith.constant 0 : index
      %19 = vector.load %arg4[%c0_17, %c0_18] : memref<128x128xbf16, #tpu.memory_space<vmem>>, vector<128x128xbf16>
      %c0_19 = arith.constant 0 : index
      %c0_20 = arith.constant 0 : index
      %20 = vector.load %arg7[%c0_19, %c0_20] : memref<128x128xbf16, #tpu.memory_space<vmem>>, vector<128x128xbf16>
      %cst_21 = arith.constant dense<0.000000e+00> : vector<128x128xf32>
      %21 = tpu.matmul %19, %20, %cst_21 {dimension_numbers = #tpu.dot_dimension_numbers<[1], [0], [0], [1], [0, 0, 1, 1], [], []>} : vector<128x128xbf16>, vector<128x128xbf16>, vector<128x128xf32> -> vector<128x128xf32>
      %22 = arith.addf %18, %21 : vector<128x128xf32>
      %c0_22 = arith.constant 0 : index
      %c0_23 = arith.constant 0 : index
      %23 = vector.load %arg8[%c0_22, %c0_23] : memref<1x128xf32, #tpu.memory_space<vmem>>, vector<1x128xf32>
      %24 = vector.broadcast %23 : vector<1x128xf32> to vector<128x128xf32>
      %25 = arith.addf %22, %24 : vector<128x128xf32>
      %c0_24 = arith.constant 0 : index
      %c0_25 = arith.constant 0 : index
      %26 = vector.load %arg9[%c0_24, %c0_25] : memref<128x128xf32, #tpu.memory_space<vmem>>, vector<128x128xf32>
      tpu.vector_store %arg9[%c0_24, %c0_25], %25 {strides = array<i32>} : memref<128x128xf32, #tpu.memory_space<vmem>>, vector<128x128xf32>,
    } else {
    }
    return
  }
  func.func @transform_0(%arg0: i32, %arg1: i32) -> (i32, i32) {
    %c0_i32 = arith.constant 0 : i32
    return %arg0, %arg1 : i32, i32
  }
  func.func @transform_1(%arg0: i32, %arg1: i32) -> (i32, i32) {
    %c0_i32 = arith.constant 0 : i32
    %c0_i32_0 = arith.constant 0 : i32
    return %arg1, %c0_i32 : i32, i32
  }
  func.func @transform_2(%arg0: i32, %arg1: i32) -> (i32, i32) {
    %c0_i32 = arith.constant 0 : i32
    %c0_i32_0 = arith.constant 0 : i32
    return %arg0, %c0_i32 : i32, i32
  }
  func.func @transform_3(%arg0: i32, %arg1: i32) -> (i32, i32) {
    %c0_i32 = arith.constant 0 : i32
    %c0_i32_0 = arith.constant 0 : i32
    return %arg0, %c0_i32 : i32, i32
  }
  func.func @transform_4(%arg0: i32, %arg1: i32) -> (i32, i32) {
    %c0_i32 = arith.constant 0 : i32
    %c0_i32_0 = arith.constant 0 : i32
    %c0_i32_1 = arith.constant 0 : i32
    return %c0_i32, %c0_i32_0 : i32, i32
  }
  func.func @transform_5(%arg0: i32, %arg1: i32) -> (i32, i32) {
    %c0_i32 = arith.constant 0 : i32
    %c0_i32_0 = arith.constant 0 : i32
    %c0_i32_1 = arith.constant 0 : i32
    return %c0_i32, %c0_i32_0 : i32, i32
  }
  func.func @transform_6(%arg0: i32, %arg1: i32) -> (i32, i32) {
    %c0_i32 = arith.constant 0 : i32
    %c0_i32_0 = arith.constant 0 : i32
    %c0_i32_1 = arith.constant 0 : i32
    return %c0_i32, %c0_i32_0 : i32, i32
  }
  func.func @transform_7(%arg0: i32, %arg1: i32) -> (i32, i32) {
    %c0_i32 = arith.constant 0 : i32
    %c0_i32_0 = arith.constant 0 : i32
    return %arg0, %c0_i32 : i32, i32
  }
}

</mosaic_0001>

<bundles_post_ra>
// kernel: tpu_custom_call.1
= control target key start
LH: loop header
LB: loop body
LE: loop exit
PB: predicated region body
PF: predicated region fallthrough
CT: control target
= control target key end

     0   :  { %12 = vsyncpa [#allocation4], 0  ;;  %s1524_s0 = inlined_call_operand.vmem [shape: bf16[128,128], index: 0, kind: input, shape index: {}]   ;;  %s1525_s1 = inlined_call_operand.vmem [shape: bf16[128,128], index: 1, kind: input, shape index: {}]   ;;  %s1526_s2 = inlined_call_operand.hbm [shape: bf16[128,128], index: 2, kind: input, shape index: {}]   ;;  %s1527_s3 = inlined_call_operand.vmem [shape: f32[128,1], index: 3, kind: input, shape index: {}]   ;;  %s1528_s4 = inlined_call_operand.hbm [shape: bf16[128,128], index: 4, kind: input, shape index: {}]   ;;  %s1529_s5 = inlined_call_operand.hbm [shape: bf16[128,128], index: 5, kind: input, shape index: {}]   ;;  %s1530_s6 = inlined_call_operand.vmem [shape: f32[1,128], index: 6, kind: input, shape index: {}]   ;;  %s1531_s7 = inlined_call_operand.hbm [shape: f32[128,128], index: 7, kind: output, shape index: {}]  }
   0x1   :  { %13 = vsyncpa [#allocation7], 0 }
   0x2   :  { %14 = vsyncpa [#allocation5], 0  ;;  %s1306_s24 = smov [#allocation6]   ;;  %s1307_s26 = smov [#allocation3]  }
   0x3   :  { %s38_s25 = sshll.u32 %s1306_s24, 4  ;;  %s24_s27 = sshll.u32 %s1307_s26, 4  ;;  %s39_s25 = int_to_ptr.vmem [resolvable:$true] %s38_s25  ;;  %s1355_s27 = int_to_ptr.vmem [resolvable:$true] %s24_s27 }
   0x4   :  { %s1212_s30 = scalar_lea.hbm %s1528_s4, 1024 }
   0x5   :  { %p1213_p0 = scmp.ne.s32.totalorder %s1528_s4, %s1212_s30  ;;  %p1216_p1 = scmp.lt.u32.totalorder %s1212_s30, %s1528_s4 }
   0x7   :  { %p1218_p2 = pnand %p1216_p1, %p1213_p0 }
   0x9   :  { %1221 = shalt.err (!%p1218_p2)
}
   0xa   :  { %s1222_s12 = scalar_lea.vmem %s39_s25, 1024  ;;  %p1227_p4 = scmp.lt.s32.totalorder %s39_s25, %s39_s25 }
   0xb   :  { %p1223_p3 = scmp.ne.s32.totalorder %s39_s25, %s1222_s12  ;;  %p1228_p5 = scmp.lt.s32.totalorder %s1222_s12, %s1222_s12 }
   0xd   :  { %p1229_p6 = por %p1228_p5, %p1227_p4 }
   0xf   :  { %p1230_p7 = pnand %p1229_p6, %p1223_p3 }
  0x11   :  { %1233 = shalt.err (!%p1230_p7)
}
  0x12   :  { %s1308_s13 = smov 64   ;;  %s1309_s14 = smov 4  }
  0x13   :  { %44 = dma.hbm_to_vmem [thread:$0]  %s1528_s4, 1024, %s39_s25, [#allocation7], %s1308_s13, %s1308_s13, %s1309_s14  }
  0x14   :  { %s1234_s19 = scalar_lea.hbm %s1526_s2, 1024 }
  0x15   :  { %p1235_p8 = scmp.ne.s32.totalorder %s1526_s2, %s1234_s19  ;;  %p1238_p9 = scmp.lt.u32.totalorder %s1234_s19, %s1526_s2 }
  0x17   :  { %p1240_p10 = pnand %p1238_p9, %p1235_p8 }
  0x19   :  { %1243 = shalt.err (!%p1240_p10)
}
  0x1a   :  { %s1244_s24 = scalar_lea.vmem %s1355_s27, 1024  ;;  %p1249_p12 = scmp.lt.s32.totalorder %s1355_s27, %s1355_s27 }
  0x1b   :  { %p1245_p11 = scmp.ne.s32.totalorder %s1355_s27, %s1244_s24  ;;  %p1250_p13 = scmp.lt.s32.totalorder %s1244_s24, %s1244_s24 }
  0x1d   :  { %p1251_p0 = por %p1250_p13, %p1249_p12 }
  0x1f   :  { %p1252_p1 = pnand %p1251_p0, %p1245_p11 }
  0x21   :  { %1255 = shalt.err (!%p1252_p1)
}
  0x22   :  { %30 = dma.hbm_to_vmem [thread:$0]  %s1526_s2, 1024, %s1355_s27, [#allocation4], %s1308_s13, %s1308_s13, %s1309_s14  }
  0x23   :  { %s1310_s26 = smov [#allocation8]   ;;  %s1256_s8 = scalar_lea.hbm %s1529_s5, 1024 }
  0x24   :  { %s50_s28 = sshll.u32 %s1310_s26, 4  ;;  %p1257_p2 = scmp.ne.s32.totalorder %s1529_s5, %s1256_s8  ;;  %s51_s28 = int_to_ptr.vmem [resolvable:$true] %s50_s28 }
  0x25   :  { %p1260_p3 = scmp.lt.u32.totalorder %s1256_s8, %s1529_s5 }
  0x27   :  { %p1262_p4 = pnand %p1260_p3, %p1257_p2 }
  0x29   :  { %1265 = shalt.err (!%p1262_p4)
}
  0x2a   :  { %s1266_s15 = scalar_lea.vmem %s51_s28, 1024  ;;  %p1271_p6 = scmp.lt.s32.totalorder %s51_s28, %s51_s28 }
  0x2b   :  { %p1267_p5 = scmp.ne.s32.totalorder %s51_s28, %s1266_s15  ;;  %p1272_p7 = scmp.lt.s32.totalorder %s1266_s15, %s1266_s15 }
  0x2d   :  { %p1273_p8 = por %p1272_p7, %p1271_p6 }
  0x2f   :  { %p1274_p9 = pnand %p1273_p8, %p1267_p5 }
  0x31   :  { %1277 = shalt.err (!%p1274_p9)
}
  0x32   :  { %56 = dma.hbm_to_vmem [thread:$0]  %s1529_s5, 1024, %s51_s28, [#allocation7], %s1308_s13, %s1308_s13, %s1309_s14  }
  0x33   :  { %1300 = dma.done.wait [#allocation4], 1024  }
  0x34   :  { %1301 = vsyncadd [#allocation4], 4294966272 }
  0x35   :  { %1302 = dma.done.wait [#allocation7], 2048  }
  0x36   :  { %1303 = vsyncadd [#allocation7], 4294965248  ;;  %v1311_v0 = vmov 0   ;;  %v1172_v1 = vld [vmem:[%s1525_s1] sm:$0xff]   ;;  %v1173_v2 = vld [vmem:[%s1525_s1 + $0x8] sm:$0xff]  }
  0x37   :  { %1171 = vset.pattern.permute.xlu1 %v1311_v0  ;;  %1170 = vset.pattern.permute.xlu0 %v1311_v0  ;;  %v1174_v3 = vld [vmem:[%s1525_s1 + $0x10] sm:$0xff]   ;;  %v1175_v4 = vld [vmem:[%s1525_s1 + $0x18] sm:$0xff]   ;;  %v1180_v5 = vld [vmem:[%s1524_s0] sm:$0xff]  }
  0x38   :  { %1033 = vmatprep.subr.bf16.mxu0 %v1172_v1  ;;  %1049 = vmatprep.mubr.bf16.mxu0 %v1180_v5  ;;  %v1176_v6 = vld [vmem:[%s1525_s1 + $0x20] sm:$0xff]   ;;  %v1177_v7 = vld [vmem:[%s1525_s1 + $0x28] sm:$0xff]   ;;  %v383_v8 = vld [vmem:[%s1527_s3 + $0x10] sm:$0xff] }
  0x39   :  { %1034 = vmatpush3.bf16.msra.mxu0 %v1172_v1  ;;  %v381_v9 = vld [vmem:[%s1527_s3] sm:$0xff]  ;;  %409 = vperm.xlu1 %1171, %v383_v8   ;;  %v384_v10 = vld [vmem:[%s1527_s3 + $0x18] sm:$0xff]  ;;  %v382_v11 = vld [vmem:[%s1527_s3 + $0x8] sm:$0xff] }
  0x3a   :  { %1035 = vmatprep.subr.bf16.mxu0 %v1173_v2  ;;  %399 = vperm.xlu0 %1170, %v381_v9   ;;  %v1178_v12 = vld [vmem:[%s1525_s1 + $0x30] sm:$0xff]   ;;  %v390_v13 = vld [vmem:[%s1527_s3 + $0x48] sm:$0xff]  ;;  %v389_v14 = vld [vmem:[%s1527_s3 + $0x40] sm:$0xff] }
  0x3b   :  { %v1188_v15 = vld [vmem:[#allocation8] sm:$0xff]   ;;  %v1189_v16 = vld [vmem:[#allocation8 + $0x8] sm:$0xff]   ;;  %v1179_v17 = vld [vmem:[%s1525_s1 + $0x38] sm:$0xff]  }
  0x3c   :  { %1065 = vmatprep.subr.bf16.mxu1 %v1188_v15  ;;  %v392_v18 = vld [vmem:[%s1527_s3 + $0x58] sm:$0xff]  ;;  %v391_v19 = vld [vmem:[%s1527_s3 + $0x50] sm:$0xff]  ;;  %v1181_v21 = vld [vmem:[%s1524_s0 + $0x8] sm:$0xff]  }
  0x3d   :  { %1036 = vmatpush3.bf16.msra.mxu0 %v1173_v2  ;;  %414 = vperm.xlu1 %1171, %v384_v10   ;;  %v1190_v20 = vld [vmem:[#allocation8 + $0x10] sm:$0xff]   ;;  %v1461_v22 = vld [vmem:[#allocation6] sm:$0xff]   ;;  %v386_v24 = vld [vmem:[%s1527_s3 + $0x28] sm:$0xff] }
  0x3e   :  { %1037 = vmatprep.subr.bf16.mxu0 %v1174_v3  ;;  %404 = vperm.xlu0 %1170, %v382_v11   ;;  %v1182_v23 = vld [vmem:[%s1524_s0 + $0x10] sm:$0xff]   ;;  %v385_v25 = vld [vmem:[%s1527_s3 + $0x20] sm:$0xff]  ;;  %v1191_v26 = vld [vmem:[#allocation8 + $0x18] sm:$0xff]  }
  0x3f   :  { %1066 = vmatpush3.bf16.msra.mxu1 %v1188_v15  ;;  %v388_v27 = vld [vmem:[%s1527_s3 + $0x38] sm:$0xff]  ;;  %v387_v28 = vld [vmem:[%s1527_s3 + $0x30] sm:$0xff]  ;;  %v1199_v29 = vld [vmem:[#allocation3] sm:$0xff]  }
  0x40   :  { %1067 = vmatprep.subr.bf16.mxu1 %v1189_v16  ;;  %v1195_v30 = vld [vmem:[#allocation6 + $0x8] sm:$0xff]   ;;  %v1192_v31 = vld [vmem:[#allocation8 + $0x20] sm:$0xff]   ;;  %v1183_v32 = vld [vmem:[%s1524_s0 + $0x18] sm:$0xff]   ;;  %1081 = vmatprep.mubr.bf16.mxu1 %v1199_v29 }
  0x41   :  { %1038 = vmatpush3.bf16.msra.mxu0 %v1174_v3  ;;  %444 = vperm.xlu1 %1171, %v390_v13   ;;  %v394_v33 = vld [vmem:[%s1527_s3 + $0x68] sm:$0xff]  ;;  %v393_v34 = vld [vmem:[%s1527_s3 + $0x60] sm:$0xff]  ;;  %v396_v37 = vld [vmem:[%s1527_s3 + $0x78] sm:$0xff] }
  0x42   :  { %1039 = vmatprep.subr.bf16.mxu0 %v1175_v4  ;;  %439 = vperm.xlu0 %1170, %v389_v14   ;;  %v1184_v35 = vld [vmem:[%s1524_s0 + $0x20] sm:$0xff]   ;;  %v1194_v36 = vld [vmem:[#allocation8 + $0x28] sm:$0xff]   ;;  %v395_v38 = vld [vmem:[%s1527_s3 + $0x70] sm:$0xff] }
  0x43   :  { %1068 = vmatpush3.bf16.msra.mxu1 %v1189_v16  ;;  %v1197_v39 = vld [vmem:[#allocation6 + $0x10] sm:$0xff]   ;;  %v1200_v41 = vld [vmem:[#allocation6 + $0x18] sm:$0xff]   ;;  %v1185_v42 = vld [vmem:[%s1524_s0 + $0x28] sm:$0xff]  }
  0x44   :  { %1069 = vmatprep.subr.bf16.mxu1 %v1190_v20  ;;  %v1196_v40 = vld [vmem:[#allocation8 + $0x30] sm:$0xff]   ;;  %v1198_v44 = vld [vmem:[#allocation8 + $0x38] sm:$0xff]   ;;  %v1202_v45 = vld [vmem:[#allocation6 + $0x20] sm:$0xff]  }
  0x45   :  { %1040 = vmatpush3.bf16.msra.mxu0 %v1175_v4  ;;  %454 = vperm.xlu1 %1171, %v392_v18   ;;  %v1186_v43 = vld [vmem:[%s1524_s0 + $0x30] sm:$0xff]   ;;  %v1201_v46 = vld [vmem:[#allocation3 + $0x8] sm:$0xff]   ;;  %v1187_v48 = vld [vmem:[%s1524_s0 + $0x38] sm:$0xff]  }
  0x46   :  { %1041 = vmatprep.subr.bf16.mxu0 %v1176_v6  ;;  %449 = vperm.xlu0 %1170, %v391_v19   ;;  %v1204_v47 = vld [vmem:[#allocation6 + $0x28] sm:$0xff]   ;;  %v1203_v49 = vld [vmem:[#allocation3 + $0x10] sm:$0xff]   ;;  %v1205_v50 = vld [vmem:[#allocation3 + $0x18] sm:$0xff]  }
  0x47   :  { %1070 = vmatpush3.bf16.msra.mxu1 %v1190_v20  ;;  %v1206_v51 = vld [vmem:[#allocation6 + $0x30] sm:$0xff]   ;;  %v1207_v52 = vld [vmem:[#allocation6 + $0x38] sm:$0xff]   ;;  %v1208_v53 = vld [vmem:[#allocation3 + $0x20] sm:$0xff]  }
  0x48   :  { %1071 = vmatprep.subr.bf16.mxu1 %v1191_v26  ;;  %v1209_v54 = vld [vmem:[#allocation3 + $0x28] sm:$0xff]   ;;  %v1210_v55 = vld [vmem:[#allocation3 + $0x30] sm:$0xff]   ;;  %v1211_v56 = vld [vmem:[#allocation3 + $0x38] sm:$0xff]  }
  0x49   :  { %1042 = vmatpush3.bf16.msra.mxu0 %v1176_v6  ;;  %424 = vperm.xlu1 %1171, %v386_v24  }
  0x4a   :  { %1043 = vmatprep.subr.bf16.mxu0 %v1177_v7  ;;  %419 = vperm.xlu0 %1170, %v385_v25  }
  0x4b   :  { %1072 = vmatpush3.bf16.msra.mxu1 %v1191_v26 }
  0x4c   :  { %1073 = vmatprep.subr.bf16.mxu1 %v1192_v31 }
  0x4d   :  { %1044 = vmatpush3.bf16.msra.mxu0 %v1177_v7  ;;  %434 = vperm.xlu1 %1171, %v388_v27  }
  0x4e   :  { %1045 = vmatprep.subr.bf16.mxu0 %v1178_v12  ;;  %429 = vperm.xlu0 %1170, %v387_v28  }
  0x4f   :  { %1074 = vmatpush3.bf16.msra.mxu1 %v1192_v31 }
  0x50   :  { %1075 = vmatprep.subr.bf16.mxu1 %v1194_v36 }
  0x51   :  { %1046 = vmatpush3.bf16.msra.mxu0 %v1178_v12  ;;  %464 = vperm.xlu1 %1171, %v394_v33  }
  0x52   :  { %1047 = vmatprep.subr.bf16.mxu0 %v1179_v17  ;;  %459 = vperm.xlu0 %1170, %v393_v34  }
  0x53   :  { %1076 = vmatpush3.bf16.msra.mxu1 %v1194_v36 }
  0x54   :  { %1077 = vmatprep.subr.bf16.mxu1 %v1196_v40 }
  0x55   :  { %1048 = vmatpush3.bf16.msra.mxu0 %v1179_v17  ;;  %474 = vperm.xlu1 %1171, %v396_v37  }
  0x56   :  { %1097 = vmatprep.subr.bf16.mxu0 %v1461_v22  ;;  %469 = vperm.xlu0 %1170, %v395_v38  }
  0x57   :  { %1078 = vmatpush3.bf16.msra.mxu1 %v1196_v40 }
  0x58   :  { %1050 = vmatmul.mubr.bf16.vlgmr.msra.gmra.mrb[0].mxu0 %v1181_v21  ;;  %1079 = vmatprep.subr.bf16.mxu1 %v1198_v44 }
  0x59   :  { %1053 = vmatprep.mubr.bf16.mxu0 %v1182_v23  ;;  %1098 = vmatpush3.bf16.msra.mxu0 %v1461_v22 }
  0x5a   :  { %1099 = vmatprep.subr.bf16.mxu0 %v1195_v30 }
  0x5b   :  { %1080 = vmatpush3.bf16.msra.mxu1 %v1198_v44 }
  0x5c   :  { %1129 = vmatprep.subr.bf16.mxu1 %v1461_v22 }
  0x5d   :  { %1100 = vmatpush3.bf16.msra.mxu0 %v1195_v30 }
  0x5e   :  { %1101 = vmatprep.subr.bf16.mxu0 %v1197_v39  ;;  %1082 = vmatmul.mubr.bf16.vlgmr.msra.gmra.mrb[0].mxu1 %v1201_v46 }
  0x5f   :  { %1137 = vmatpush3.bf16.msra.mxu1 %v1461_v22  ;;  %1085 = vmatprep.mubr.bf16.mxu1 %v1203_v49 }
  0x60   :  { %1054 = vmatmul.mubr.bf16.gmra.mrb[4].mxu0 %v1183_v32  ;;  %1130 = vmatprep.subr.bf16.mxu1 %v1195_v30 }
  0x61   :  { %1057 = vmatprep.mubr.bf16.mxu0 %v1184_v35  ;;  %1102 = vmatpush3.bf16.msra.mxu0 %v1197_v39 }
  0x62   :  { %1103 = vmatprep.subr.bf16.mxu0 %v1200_v41 }
  0x63   :  { %1138 = vmatpush3.bf16.msra.mxu1 %v1195_v30 }
  0x64   :  { %1131 = vmatprep.subr.bf16.mxu1 %v1197_v39 }
  0x65   :  { %1104 = vmatpush3.bf16.msra.mxu0 %v1200_v41 }
  0x66   :  { %1105 = vmatprep.subr.bf16.mxu0 %v1202_v45  ;;  %1086 = vmatmul.mubr.bf16.gmra.mrb[4].mxu1 %v1205_v50 }
  0x67   :  { %1139 = vmatpush3.bf16.msra.mxu1 %v1197_v39  ;;  %1089 = vmatprep.mubr.bf16.mxu1 %v1208_v53 }
  0x68   :  { %1058 = vmatmul.mubr.bf16.gmra.mrb[8].mxu0 %v1185_v42  ;;  %1132 = vmatprep.subr.bf16.mxu1 %v1200_v41 }
  0x69   :  { %1061 = vmatprep.mubr.bf16.mxu0 %v1186_v43  ;;  %1106 = vmatpush3.bf16.msra.mxu0 %v1202_v45 }
  0x6a   :  { %1107 = vmatprep.subr.bf16.mxu0 %v1204_v47 }
  0x6b   :  { %1140 = vmatpush3.bf16.msra.mxu1 %v1200_v41 }
  0x6c   :  { %1133 = vmatprep.subr.bf16.mxu1 %v1202_v45 }
  0x6d   :  { %1108 = vmatpush3.bf16.msra.mxu0 %v1204_v47 }
  0x6e   :  { %1109 = vmatprep.subr.bf16.mxu0 %v1206_v51  ;;  %1090 = vmatmul.mubr.bf16.gmra.mrb[8].mxu1 %v1209_v54 }
  0x6f   :  { %1141 = vmatpush3.bf16.msra.mxu1 %v1202_v45  ;;  %1093 = vmatprep.mubr.bf16.mxu1 %v1210_v55 }
  0x70   :  { %1062 = vmatmul.mubr.bf16.gmra.mrb[12].mxu0 %v1187_v48  ;;  %1134 = vmatprep.subr.bf16.mxu1 %v1204_v47 }
  0x71   :  { %1110 = vmatpush3.bf16.msra.mxu0 %v1206_v51 }
  0x72   :  { %1111 = vmatprep.subr.bf16.mxu0 %v1207_v52 }
  0x73   :  { %1142 = vmatpush3.bf16.msra.mxu1 %v1204_v47 }
  0x74   :  { %1135 = vmatprep.subr.bf16.mxu1 %v1206_v51 }
  0x75   :  { %1112 = vmatpush3.bf16.msra.mxu0 %v1207_v52 }
  0x76   :  { %1094 = vmatmul.mubr.bf16.gmra.mrb[12].mxu1 %v1211_v56 }
  0x77   :  { %1143 = vmatpush3.bf16.msra.mxu1 %v1206_v51 }
  0x78   :  { %1136 = vmatprep.subr.bf16.mxu1 %v1207_v52 }
  0x7b   :  { %1144 = vmatpush3.bf16.msra.mxu1 %v1207_v52 }
  0xb8   :  { %v410_v57 = vpop.permute.xlu1 %409 }
  0xb9   :  { %v400_v58 = vpop.permute.xlu0 %399 }
  0xbc   :  { %v415_v59 = vpop.permute.xlu1 %414 }
  0xbd   :  { %v405_v60 = vpop.permute.xlu0 %404 }
  0xc0   :  { %v445_v61 = vpop.permute.xlu1 %444 }
  0xc1   :  { %v440_v62 = vpop.permute.xlu0 %439 }
  0xc4   :  { %v455_v63 = vpop.permute.xlu1 %454 }
  0xc5   :  { %v450_v0 = vpop.permute.xlu0 %449 }
  0xc8   :  { %v425_v4 = vpop.permute.xlu1 %424 }
  0xc9   :  { %v420_v8 = vpop.permute.xlu0 %419 }
  0xcc   :  { %v435_v14 = vpop.permute.xlu1 %434 }
  0xcd   :  { %v430_v16 = vpop.permute.xlu0 %429 }
  0xd0   :  { %v465_v25 = vpop.permute.xlu1 %464 }
  0xd1   :  { %v460_v27 = vpop.permute.xlu0 %459 }
  0xd4   :  { %v475_v36 = vpop.permute.xlu1 %474 }
  0xd5   :  { %v470_v38 = vpop.permute.xlu0 %469 }
 0x12b   :  { %v1051_v1 = vpop.f32.mrb[0].mxu0 }
 0x12c   :  { %v267_v2 = vpop.f32.mrb[1].mxu0  ;;  %v479_v5 = vmul.f32 %v1051_v1, %v410_v57 }
 0x12d   :  { %v1052_v3 = vpop.f32.mrb[2].mxu0  ;;  %v477_v9 = vmul.f32 %v400_v58, %v267_v2  ;;  %v984_v58 = vld [vmem:[%s1530_s6] ss:$0 sm:$0xff]  ;;  %s1312_s6 = smov [#allocation9]  }
 0x12e   :  { %v480_v6 = vmul.f32 %v1052_v3, %v415_v59  ;;  %v270_v7 = vpop.f32.mrb[3].mxu0  ;;  %s931_s23 = sshll.u32 %s1312_s6, 4  ;;  %s932_s23 = int_to_ptr.vmem [resolvable:$true] %s931_s23 }
 0x12f   :  { %v478_v10 = vmul.f32 %v405_v60, %v270_v7  ;;  %s1278_s24 = scalar_lea.vmem %s932_s23, 2048  ;;  %p1283_p11 = scmp.lt.s32.totalorder %s932_s23, %s932_s23 }
 0x130   :  { %v494_v11 = vpack.c.bf16 %v480_v6, %v479_v5  ;;  %p1279_p10 = scmp.ne.s32.totalorder %s932_s23, %s1278_s24  ;;  %p1284_p12 = scmp.lt.s32.totalorder %s1278_s24, %s1278_s24 }
 0x131   :  { %v493_v12 = vpack.c.bf16 %v478_v10, %v477_v9  ;;  %v1083_v39 = vpop.f32.mrb[0].mxu1 }
 0x132   :  { %v679_v41 = vpop.f32.mrb[1].mxu1  ;;  %p1285_p13 = por %p1284_p12, %p1283_p11 }
 0x133   :  { %v1055_v13 = vpop.f32.mrb[4].mxu0  ;;  %1113 = vmatprep.mubr.bf16.mxu0 %v493_v12  ;;  %v1084_v43 = vpop.f32.mrb[2].mxu1 }
 0x134   :  { %v283_v15 = vpop.f32.mrb[5].mxu0  ;;  %1114 = vmatmul.mubr.bf16.vlgmr.msra.gmra.mrb[16].mxu0 %v494_v11  ;;  %v483_v18 = vmul.f32 %v1055_v13, %v430_v16  ;;  %v682_v45 = vpop.f32.mrb[3].mxu1  ;;  %p1286_p0 = pnand %p1285_p13, %p1279_p10 }
 0x135   :  { %v1056_v17 = vpop.f32.mrb[6].mxu0  ;;  %v481_v21 = vmul.f32 %v420_v8, %v283_v15 }
 0x136   :  { %v484_v19 = vmul.f32 %v1056_v17, %v435_v14  ;;  %v286_v20 = vpop.f32.mrb[7].mxu0 }
 0x137   :  { %v482_v22 = vmul.f32 %v425_v4, %v286_v20 }
 0x138   :  { %v496_v23 = vpack.c.bf16 %v484_v19, %v483_v18 }
 0x139   :  { %v495_v24 = vpack.c.bf16 %v482_v22, %v481_v21  ;;  %v1087_v53 = vpop.f32.mrb[4].mxu1 }
 0x13a   :  { %v695_v54 = vpop.f32.mrb[5].mxu1 }
 0x13b   :  { %v1059_v26 = vpop.f32.mrb[8].mxu0  ;;  %1117 = vmatprep.mubr.bf16.mxu0 %v495_v24  ;;  %v1088_v55 = vpop.f32.mrb[6].mxu1 }
 0x13c   :  { %v299_v28 = vpop.f32.mrb[9].mxu0  ;;  %1118 = vmatmul.mubr.bf16.gmra.mrb[20].mxu0 %v496_v23  ;;  %v487_v30 = vmul.f32 %v1059_v26, %v450_v0  ;;  %v698_v56 = vpop.f32.mrb[7].mxu1 }
 0x13d   :  { %v1060_v29 = vpop.f32.mrb[10].mxu0  ;;  %v485_v33 = vmul.f32 %v440_v62, %v299_v28 }
 0x13e   :  { %v488_v31 = vmul.f32 %v1060_v29, %v455_v63  ;;  %v302_v32 = vpop.f32.mrb[11].mxu0 }
 0x13f   :  { %v486_v34 = vmul.f32 %v445_v61, %v302_v32 }
 0x140   :  { %v498_v35 = vpack.c.bf16 %v488_v31, %v487_v30 }
 0x141   :  { %v497_v37 = vpack.c.bf16 %v486_v34, %v485_v33 }
 0x143   :  { %v1063_v40 = vpop.f32.mrb[12].mxu0  ;;  %1121 = vmatprep.mubr.bf16.mxu1 %v497_v37 }
 0x144   :  { %v315_v42 = vpop.f32.mrb[13].mxu0  ;;  %1122 = vmatmul.mubr.bf16.vlgmr.msra.gmra.mrb[8].mxu1 %v498_v35  ;;  %v491_v46 = vmul.f32 %v1063_v40, %v470_v38 }
 0x145   :  { %v1064_v44 = vpop.f32.mrb[14].mxu0  ;;  %v489_v49 = vmul.f32 %v460_v27, %v315_v42 }
 0x146   :  { %v492_v47 = vmul.f32 %v1064_v44, %v475_v36  ;;  %v318_v48 = vpop.f32.mrb[15].mxu0 }
 0x147   :  { %v490_v50 = vmul.f32 %v465_v25, %v318_v48 }
 0x148   :  { %v500_v51 = vpack.c.bf16 %v492_v47, %v491_v46 }
 0x149   :  { %v499_v52 = vpack.c.bf16 %v490_v50, %v489_v49 }
 0x14b   :  { %1125 = vmatprep.mubr.bf16.mxu1 %v499_v52 }
 0x14c   :  { %1126 = vmatmul.mubr.bf16.gmra.mrb[12].mxu1 %v500_v51 }
 0x207   :  { %v1115_v57 = vpop.f32.mrb[16].mxu0 }
 0x208   :  { %v833_v59 = vadd.f32 %v1115_v57, %v1083_v39  ;;  %v824_v60 = vpop.f32.mrb[17].mxu0 }
 0x209   :  { %v825_v61 = vadd.f32 %v824_v60, %v679_v41  ;;  %v1116_v62 = vpop.f32.mrb[18].mxu0 }
 0x20a   :  { %v896_v63 = vadd.f32 %v984_v58, %v833_v59  ;;  %v836_v0 = vadd.f32 %v1116_v62, %v1084_v43  ;;  %v827_v1 = vpop.f32.mrb[19].mxu0 }
 0x20b   :  { %v894_v2 = vadd.f32 %v984_v58, %v825_v61  ;;  %v828_v3 = vadd.f32 %v827_v1, %v682_v45 }
 0x20c   :  { %912 = vst [vmem:[#allocation9 + $0x10] sm:$0xff] %v896_v63  ;;  %v897_v4 = vadd.f32 %v984_v58, %v836_v0 }
 0x20d   :  { %910 = vst [vmem:[#allocation9] sm:$0xff] %v894_v2  ;;  %v895_v5 = vadd.f32 %v984_v58, %v828_v3 }
 0x20e   :  { %913 = vst [vmem:[#allocation9 + $0x18] sm:$0xff] %v897_v4 }
 0x20f   :  { %911 = vst [vmem:[#allocation9 + $0x8] sm:$0xff] %v895_v5  ;;  %v1119_v6 = vpop.f32.mrb[20].mxu0 }
 0x210   :  { %v849_v7 = vadd.f32 %v1119_v6, %v1087_v53  ;;  %v840_v8 = vpop.f32.mrb[21].mxu0 }
 0x211   :  { %v841_v9 = vadd.f32 %v840_v8, %v695_v54  ;;  %v1120_v10 = vpop.f32.mrb[22].mxu0 }
 0x212   :  { %v900_v11 = vadd.f32 %v984_v58, %v849_v7  ;;  %v852_v12 = vadd.f32 %v1120_v10, %v1088_v55  ;;  %v843_v13 = vpop.f32.mrb[23].mxu0 }
 0x213   :  { %v898_v14 = vadd.f32 %v984_v58, %v841_v9  ;;  %v844_v15 = vadd.f32 %v843_v13, %v698_v56 }
 0x214   :  { %916 = vst [vmem:[#allocation9 + $0x30] sm:$0xff] %v900_v11  ;;  %v901_v16 = vadd.f32 %v984_v58, %v852_v12 }
 0x215   :  { %914 = vst [vmem:[#allocation9 + $0x20] sm:$0xff] %v898_v14  ;;  %v899_v17 = vadd.f32 %v984_v58, %v844_v15 }
 0x216   :  { %917 = vst [vmem:[#allocation9 + $0x38] sm:$0xff] %v901_v16 }
 0x217   :  { %915 = vst [vmem:[#allocation9 + $0x28] sm:$0xff] %v899_v17  ;;  %v1123_v18 = vpop.f32.mrb[8].mxu1 }
 0x218   :  { %v904_v19 = vadd.f32 %v1123_v18, %v984_v58  ;;  %v856_v20 = vpop.f32.mrb[9].mxu1 }
 0x219   :  { %v902_v21 = vadd.f32 %v984_v58, %v856_v20  ;;  %v1124_v22 = vpop.f32.mrb[10].mxu1 }
 0x21a   :  { %920 = vst [vmem:[#allocation9 + $0x50] sm:$0xff] %v904_v19  ;;  %v905_v23 = vadd.f32 %v1124_v22, %v984_v58  ;;  %v859_v24 = vpop.f32.mrb[11].mxu1 }
 0x21b   :  { %918 = vst [vmem:[#allocation9 + $0x40] sm:$0xff] %v902_v21  ;;  %v903_v25 = vadd.f32 %v984_v58, %v859_v24 }
 0x21c   :  { %921 = vst [vmem:[#allocation9 + $0x58] sm:$0xff] %v905_v23 }
 0x21d   :  { %919 = vst [vmem:[#allocation9 + $0x48] sm:$0xff] %v903_v25 }
 0x21f   :  { %v1127_v26 = vpop.f32.mrb[12].mxu1 }
 0x220   :  { %v908_v27 = vadd.f32 %v1127_v26, %v984_v58  ;;  %v872_v28 = vpop.f32.mrb[13].mxu1 }
 0x221   :  { %v906_v29 = vadd.f32 %v984_v58, %v872_v28  ;;  %v1128_v30 = vpop.f32.mrb[14].mxu1 }
 0x222   :  { %924 = vst [vmem:[#allocation9 + $0x70] sm:$0xff] %v908_v27  ;;  %v909_v31 = vadd.f32 %v1128_v30, %v984_v58  ;;  %v875_v32 = vpop.f32.mrb[15].mxu1 }
 0x223   :  { %922 = vst [vmem:[#allocation9 + $0x60] sm:$0xff] %v906_v29  ;;  %v907_v33 = vadd.f32 %v984_v58, %v875_v32 }
 0x224   :  { %925 = vst [vmem:[#allocation9 + $0x78] sm:$0xff] %v909_v31 }
 0x225   :  { %923 = vst [vmem:[#allocation9 + $0x68] sm:$0xff] %v907_v33 }
 0x226   :  { %1289 = shalt.err (!%p1286_p0)
}
 0x227   :  { %s1290_s26 = scalar_lea.hbm %s1531_s7, 2048 }
 0x228   :  { %p1291_p1 = scmp.ne.s32.totalorder %s1531_s7, %s1290_s26  ;;  %p1294_p2 = scmp.lt.u32.totalorder %s1290_s26, %s1531_s7 }
 0x22a   :  { %p1296_p3 = pnand %p1294_p2, %p1291_p1 }
 0x22c   :  { %1299 = shalt.err (!%p1296_p3)
}
 0x22d   :  { %s1313_s9 = smov 128   ;;  %s1314_s10 = smov 8  }
 0x22e   :  { %937 = dma.vmem_to_hbm [thread:$0]  %s932_s23, 2048, %s1531_s7, [#allocation5], %s1313_s9, %s1313_s9, %s1314_s10  }
 0x22f   :  { %1304 = dma.done.wait [#allocation5], 2048  }
 0x230   :  { %1305 = vsyncadd [#allocation5], 4294965248 }
 0x231   :  { %941 = vsyncpa [#allocation4], 1 }
 0x232   :  { %942 = vsyncpa [#allocation7], 1 }
 0x233   :  { %943 = vsyncpa [#allocation5], 1 }

</bundles_post_ra>
